<compile_context>
chip_gen: v6e
topology: v6e:2x2x1
jax: 0.10.0
libtpu: 0.0.40
codegen_flags: <defaults>
</compile_context>

<pallas_src>
import functools
import math

import jax
import jax.numpy as jnp
from jax.experimental import pallas as pl
from jax.experimental.pallas import tpu as pltpu

_NEG_LOG_1E4 = -math.log(1e-4)  # = -log(clip floor of one-hot) ~ 9.2103


def sce_kernel(pred_ref, labels_ref, out_ref, *, alpha, beta, n_total):
    i = pl.program_id(0)

    logits = pred_ref[...].astype(jnp.float32)       # (TM, C); upcast from HBM dtype
    labels = labels_ref[...]                          # (TM, 1) int32
    tm, c = logits.shape

    # --- stable softmax pieces (no full (TM, C) log_probs materialized) ----
    m = jnp.max(logits, axis=1, keepdims=True)        # (TM, 1)
    shifted = logits - m                               # (TM, C)
    expv = jnp.exp(shifted)                            # (TM, C)  only full-tile EUP op
    sumexp = jnp.sum(expv, axis=1, keepdims=True)      # (TM, 1)
    log_sumexp = jnp.log(sumexp)                       # (TM, 1)
    # Exact reciprocal: approx=True error is amplified ~9.21x in RCE and
    # breaks the 5e-4 tolerance, while the exact divide is only (TM, 1) wide.
    inv_sumexp = 1.0 / sumexp                          # (TM, 1)

    # Boolean true-class mask (no f32 one_hot materialized).
    class_iota = jax.lax.broadcasted_iota(jnp.int32, (tm, c), 1)
    true_mask = class_iota == labels                   # (TM, C) bool

    # --- CE: -log_softmax at the true class --------------------------------
    shifted_true = jnp.sum(jnp.where(true_mask, shifted, 0.0),
                           axis=1, keepdims=True)      # (TM, 1)
    ce_per = log_sumexp - shifted_true                  # (TM, 1)

    # --- RCE closed form ----------------------------------------------------
    # log(clip(one_hot, 1e-4, 1)) == 0 at the true class, log(1e-4) elsewhere:
    #   rce_per = -log(1e-4) * (sum_j clip(p_j, 1e-7, 1) - clip(p_true, 1e-7, 1))
    probs = jnp.clip(expv * inv_sumexp, 1e-7, 1.0)      # (TM, C)
    sum_probs = jnp.sum(probs, axis=1, keepdims=True)   # (TM, 1)
    # p_true from shifted_true: one narrow exp, no extra (TM, C) pass.
    p_true = jnp.clip(jnp.exp(shifted_true) * inv_sumexp, 1e-7, 1.0)  # (TM, 1)
    rce_per = _NEG_LOG_1E4 * (sum_probs - p_true)        # (TM, 1)

    # --- mask padded tail rows (when n_total % TM != 0), fuse reductions ----
    row_ids = i * tm + jax.lax.broadcasted_iota(jnp.int32, (tm, 1), 0)
    valid = row_ids < n_total
    combined = jnp.where(valid, alpha * ce_per + beta * rce_per, 0.0)

    # Per-tile partial sum; the 1/N scale and final sum happen in the wrapper.
    out_ref[...] = jnp.sum(combined, axis=0, keepdims=True)   # (1, 1)


def _choose_tile_rows(n, c, itemsize):
    # VMEM bytes per batch row, counting lane padding (minor dim pads to 128):
    #   * double-buffered pred tile in its HBM dtype,
    #   * ~5 full-width f32 in-kernel temporaries (logits, shifted, expv,
    #     probs, mask/where intermediates),
    #   * double-buffered (TM, 1) labels column.
    # Budget ~24 MiB so the total stays inside the default scoped VMEM on
    # every generation (v7x: 64 MiB physical / 32 MiB scoped).
    c_pad = ((c + 127) // 128) * 128
    per_row = c_pad * (2 * itemsize + 5 * 4) + 2 * 128 * 4
    budget_bytes = 24 * 1024 * 1024
    tm = budget_bytes // per_row
    tm = max(8, (tm // 8) * 8)
    if tm >= n:
        return n           # single full-array block (always a legal block shape)
    return tm              # multiple of 8 -> legal sublane block size


def sce_loss(pred, labels, *, alpha, beta, num_classes, tile_rows=None):
    n, c = pred.shape
    assert c == num_classes
    # Labels as a (N, 1) int32 column so the one-hot compare is a vector op.
    labels_2d = labels.astype(jnp.int32).reshape(n, 1)

    itemsize = jnp.dtype(pred.dtype).itemsize
    tm = tile_rows if tile_rows is not None else _choose_tile_rows(n, c, itemsize)
    grid_size = pl.cdiv(n, tm)

    cost = pl.CostEstimate(
        flops=8 * n * c,
        transcendentals=n * c + 3 * n,   # exp over (N,C); log/exp/recip per row
        bytes_accessed=n * c * itemsize + n * 4 + grid_size * 4,
    )

    partials = pl.pallas_call(
        functools.partial(sce_kernel, alpha=float(alpha), beta=float(beta),
                          n_total=n),
        # Per-tile partial sums; tiles are independent ("parallel"), so on v7x
        # the grid can be sharded across both TensorCores.
        out_shape=jax.ShapeDtypeStruct((grid_size, 1), jnp.float32),
        grid=(grid_size,),
        in_specs=[
            pl.BlockSpec((tm, c), lambda i: (i, 0)),   # pred tile (double-buffered)
            pl.BlockSpec((tm, 1), lambda i: (i, 0)),   # labels column tile
        ],
        out_specs=pl.BlockSpec((1, 1), lambda i: (i, 0)),
        compiler_params=pltpu.CompilerParams(
            dimension_semantics=("parallel",),
            vmem_limit_bytes=32 * 1024 * 1024,   # explicit: v5e default is 16 MiB
        ),
        cost_estimate=cost,
    )(pred, labels_2d)

    # Tiny final reduction + mean scale (uses the true batch size).
    return jnp.sum(partials) / n


def sce_loss_ref(pred, labels, *, alpha, beta, num_classes):
    # Pure-JAX reference mirroring the PyTorch module.
    logits = pred.astype(jnp.float32)
    log_probs = jax.nn.log_softmax(logits, axis=1)
    ce = -jnp.mean(jnp.take_along_axis(log_probs, labels[:, None], axis=1))
    probs = jnp.clip(jax.nn.softmax(logits, axis=1), 1e-7, 1.0)
    one_hot = jnp.clip(jax.nn.one_hot(labels, num_classes, dtype=jnp.float32),
                       1e-4, 1.0)
    rce = -jnp.sum(probs * jnp.log(one_hot), axis=1)
    return alpha * ce + beta * jnp.mean(rce)


if __name__ == "__main__":
    alpha, beta, num_classes = 0.1, 1.0, 10
    key = jax.random.PRNGKey(0)

    # Case 1: small batch, single full-array tile.
    batch = 8
    k_pred, k_lab, key = jax.random.split(key, 3)
    pred = jax.random.normal(k_pred, (batch, num_classes), dtype=jnp.float32)
    labels = jax.random.randint(k_lab, (batch,), 0, num_classes, dtype=jnp.int32)
    loss = jax.block_until_ready(
        sce_loss(pred, labels, alpha=alpha, beta=beta, num_classes=num_classes))
    ref = sce_loss_ref(pred, labels, alpha=alpha, beta=beta,
                       num_classes=num_classes)
    assert jnp.allclose(loss, ref, rtol=5e-4, atol=5e-4), (loss, ref)

    # Case 2: forced multi-tile (tile_rows=128 -> 5 grid steps, partial last
    # tile) to exercise the parallel per-tile partials + tail-row masking.
    batch2 = 520
    k_pred2, k_lab2, key = jax.random.split(key, 3)
    pred2 = jax.random.normal(k_pred2, (batch2, num_classes), dtype=jnp.float32)
    labels2 = jax.random.randint(k_lab2, (batch2,), 0, num_classes,
                                 dtype=jnp.int32)
    loss2 = jax.block_until_ready(
        sce_loss(pred2, labels2, alpha=alpha, beta=beta,
                 num_classes=num_classes, tile_rows=128))
    ref2 = sce_loss_ref(pred2, labels2, alpha=alpha, beta=beta,
                        num_classes=num_classes)
    assert jnp.allclose(loss2, ref2, rtol=5e-4, atol=5e-4), (loss2, ref2)

    # Case 3: bf16 pred (itemsize-aware tiling; in-kernel upcast after DMA).
    batch3 = 16
    k_pred3, k_lab3, key = jax.random.split(key, 3)
    pred3 = jax.random.normal(k_pred3, (batch3, num_classes),
                              dtype=jnp.bfloat16)
    labels3 = jax.random.randint(k_lab3, (batch3,), 0, num_classes,
                                 dtype=jnp.int32)
    loss3 = jax.block_until_ready(
        sce_loss(pred3, labels3, alpha=alpha, beta=beta,
                 num_classes=num_classes))
    ref3 = sce_loss_ref(pred3, labels3, alpha=alpha, beta=beta,
                        num_classes=num_classes)
    assert jnp.allclose(loss3, ref3, rtol=5e-4, atol=5e-4), (loss3, ref3)

    print("KERNEL_OK")
</pallas_src>

<mosaic_0001>
module attributes {stable_mosaic.version = 11 : i64} {
  func.func @sce_kernel(%arg0: i32, %arg1: memref<8x10xf32, #tpu.memory_space<vmem>>, %arg2: memref<8x1xi32, #tpu.memory_space<vmem>>, %arg3: memref<1x1xf32, #tpu.memory_space<vmem>>) attributes {dimension_semantics = [#tpu.dimension_semantics<parallel>], iteration_bounds = array<i64: 1>, scalar_prefetch = 0 : i64, scratch_operands = 0 : i64, tpu.core_type = #tpu.core_type<tc>, window_params = [{transform_indices = @transform_0, window_bounds = array<i64: 8, 10>}, {transform_indices = @transform_1, window_bounds = array<i64: 8, 1>}, {transform_indices = @transform_2, window_bounds = array<i64: 1, 1>}]} {
    %c0 = arith.constant 0 : index
    %c0_0 = arith.constant 0 : index
    %0 = vector.load %arg1[%c0, %c0_0] : memref<8x10xf32, #tpu.memory_space<vmem>>, vector<8x10xf32>
    %c0_1 = arith.constant 0 : index
    %c0_2 = arith.constant 0 : index
    %1 = vector.load %arg2[%c0_1, %c0_2] : memref<8x1xi32, #tpu.memory_space<vmem>>, vector<8x1xi32>
    %cst = arith.constant dense<0xFF800000> : vector<8xf32>
    %2 = vector.multi_reduction <maximumf>, %0, %cst [1] : vector<8x10xf32> to vector<8xf32>
    %3 = vector.shape_cast %2 : vector<8xf32> to vector<8x1xf32>
    %4 = vector.broadcast %3 : vector<8x1xf32> to vector<8x10xf32>
    %5 = arith.subf %0, %4 : vector<8x10xf32>
    %6 = math.exp %5 : vector<8x10xf32>
    %cst_3 = arith.constant dense<0.000000e+00> : vector<8xf32>
    %7 = vector.multi_reduction <add>, %6, %cst_3 [1] : vector<8x10xf32> to vector<8xf32>
    %8 = vector.shape_cast %7 : vector<8xf32> to vector<8x1xf32>
    %9 = math.log %8 : vector<8x1xf32>
    %cst_4 = arith.constant 1.000000e+00 : f32
    %10 = vector.broadcast %cst_4 : f32 to vector<8x1xf32>
    %11 = arith.divf %10, %8 : vector<8x1xf32>
    %12 = tpu.iota {dimensions = array<i32: 1>} : vector<8x10xi32>
    %13 = vector.broadcast %1 : vector<8x1xi32> to vector<8x10xi32>
    %14 = arith.cmpi eq, %12, %13 : vector<8x10xi32>
    %cst_5 = arith.constant 0.000000e+00 : f32
    %15 = vector.broadcast %cst_5 : f32 to vector<8x10xf32>
    %16 = arith.select %14, %5, %15 : vector<8x10xi1>, vector<8x10xf32>
    %cst_6 = arith.constant dense<0.000000e+00> : vector<8xf32>
    %17 = vector.multi_reduction <add>, %16, %cst_6 [1] : vector<8x10xf32> to vector<8xf32>
    %18 = vector.shape_cast %17 : vector<8xf32> to vector<8x1xf32>
    %19 = arith.subf %9, %18 : vector<8x1xf32>
    %20 = vector.broadcast %11 : vector<8x1xf32> to vector<8x10xf32>
    %21 = arith.mulf %6, %20 : vector<8x10xf32>
    %cst_7 = arith.constant 1.000000e-07 : f32
    %cst_8 = arith.constant 1.000000e+00 : f32
    %22 = vector.broadcast %cst_7 : f32 to vector<8x10xf32>
    %23 = arith.maximumf %22, %21 : vector<8x10xf32>
    %24 = vector.broadcast %cst_8 : f32 to vector<8x10xf32>
    %25 = arith.minimumf %24, %23 : vector<8x10xf32>
    %cst_9 = arith.constant dense<0.000000e+00> : vector<8xf32>
    %26 = vector.multi_reduction <add>, %25, %cst_9 [1] : vector<8x10xf32> to vector<8xf32>
    %27 = vector.shape_cast %26 : vector<8xf32> to vector<8x1xf32>
    %28 = math.exp %18 : vector<8x1xf32>
    %29 = arith.mulf %28, %11 : vector<8x1xf32>
    %cst_10 = arith.constant 1.000000e-07 : f32
    %cst_11 = arith.constant 1.000000e+00 : f32
    %30 = vector.broadcast %cst_10 : f32 to vector<8x1xf32>
    %31 = arith.maximumf %30, %29 : vector<8x1xf32>
    %32 = vector.broadcast %cst_11 : f32 to vector<8x1xf32>
    %33 = arith.minimumf %32, %31 : vector<8x1xf32>
    %34 = arith.subf %27, %33 : vector<8x1xf32>
    %cst_12 = arith.constant 9.21034049 : f32
    %35 = vector.broadcast %cst_12 : f32 to vector<8x1xf32>
    %36 = arith.mulf %35, %34 : vector<8x1xf32>
    %c8_i32 = arith.constant 8 : i32
    %37 = arith.muli %arg0, %c8_i32 : i32
    %38 = tpu.iota {dimensions = array<i32: 0>} : vector<8x1xi32>
    %39 = vector.broadcast %37 : i32 to vector<8x1xi32>
    %40 = arith.addi %39, %38 : vector<8x1xi32>
    %c8_i32_13 = arith.constant 8 : i32
    %41 = vector.broadcast %c8_i32_13 : i32 to vector<8x1xi32>
    %42 = arith.cmpi slt, %40, %41 : vector<8x1xi32>
    %cst_14 = arith.constant 1.000000e-01 : f32
    %43 = vector.broadcast %cst_14 : f32 to vector<8x1xf32>
    %44 = arith.mulf %43, %19 : vector<8x1xf32>
    %cst_15 = arith.constant 1.000000e+00 : f32
    %45 = vector.broadcast %cst_15 : f32 to vector<8x1xf32>
    %46 = arith.mulf %45, %36 : vector<8x1xf32>
    %47 = arith.addf %44, %46 : vector<8x1xf32>
    %cst_16 = arith.constant 0.000000e+00 : f32
    %48 = vector.broadcast %cst_16 : f32 to vector<8x1xf32>
    %49 = arith.select %42, %47, %48 : vector<8x1xi1>, vector<8x1xf32>
    %cst_17 = arith.constant dense<0.000000e+00> : vector<1xf32>
    %50 = vector.multi_reduction <add>, %49, %cst_17 [0] : vector<8x1xf32> to vector<1xf32>
    %51 = vector.shape_cast %50 : vector<1xf32> to vector<1x1xf32>
    %c0_18 = arith.constant 0 : index
    %c0_19 = arith.constant 0 : index
    %52 = vector.load %arg3[%c0_18, %c0_19] : memref<1x1xf32, #tpu.memory_space<vmem>>, vector<1x1xf32>
    tpu.vector_store %arg3[%c0_18, %c0_19], %51 {strides = array<i32>} : memref<1x1xf32, #tpu.memory_space<vmem>>, vector<1x1xf32>,
    return
  }
  func.func @transform_0(%arg0: i32) -> (i32, i32) {
    %c0_i32 = arith.constant 0 : i32
    %c0_i32_0 = arith.constant 0 : i32
    return %arg0, %c0_i32 : i32, i32
  }
  func.func @transform_1(%arg0: i32) -> (i32, i32) {
    %c0_i32 = arith.constant 0 : i32
    %c0_i32_0 = arith.constant 0 : i32
    return %arg0, %c0_i32 : i32, i32
  }
  func.func @transform_2(%arg0: i32) -> (i32, i32) {
    %c0_i32 = arith.constant 0 : i32
    %c0_i32_0 = arith.constant 0 : i32
    return %arg0, %c0_i32 : i32, i32
  }
}

</mosaic_0001>

<bundles_post_ra>
// kernel: tpu_custom_call.1
= control target key start
LH: loop header
LB: loop body
LE: loop exit
PB: predicated region body
PF: predicated region fallthrough
CT: control target
= control target key end

     0   :  { %vm14_vm0 = vcmask 80896   ;;  %s147_s0 = inlined_call_operand.vmem [shape: f32[8,10], index: 0, kind: input, shape index: {}]   ;;  %s148_s1 = inlined_call_operand.vmem [shape: s32[8,1], index: 1, kind: input, shape index: {}]   ;;  %s149_s2 = inlined_call_operand.hbm [shape: f32[1,1], index: 2, kind: output, shape index: {}]  }
   0x1   :  { %v12_v0 = vld [vmem:[%s147_s0] sm:$0xff] }
   0x2   :  { %v13_v1 = vld [vmem:[%s148_s1] sm:$0xff] }
   0x3   :  { %7 = vsyncpa [#allocation3], 0  ;;  %v15_v2 = vsel %vm14_vm0, %v12_v0, -inf  ;;  %v117_v3 = vmov 0   ;;  %v28_v4 = vlaneseq  ;;  %s118_s0 = smov [#allocation2]   ;;  %vm67_vm2 = vcmask 0  }
   0x4   :  { %85 = vset.pattern.permute.xlu1 %v117_v3  ;;  %86 = vset.pattern.permute.xlu0 %v117_v3  ;;  %s75_s1 = sshll.u32 %s118_s0, 4  ;;  %s76_s1 = int_to_ptr.vmem [resolvable:$true] %s75_s1 }
   0x5   :  { %16 = vmax.xlane.f32.xlu0 %v15_v2  ;;  %31 = vperm.xlu1 %85, %v13_v1   ;;  %v29_v5 = vand.u32 127, %v28_v4  ;;  %s95_s13 = scalar_lea.vmem %s76_s1, 16  ;;  %s99_s14 = scalar_lea.vmem %s76_s1, 32 }
   0x6   :  { %p96_p0 = scmp.ne.s32.totalorder %s76_s1, %s95_s13  ;;  %p100_p1 = scmp.lt.s32.totalorder %s76_s1, %s76_s1 }
   0x7   :  { %p101_p2 = scmp.lt.s32.totalorder %s99_s14, %s95_s13 }
   0x9   :  { %p102_p3 = por %p101_p2, %p100_p1 }
   0xb   :  { %p103_p4 = pnand %p102_p3, %p96_p0 }
  0x80   :  { %v32_v6 = vpop.permute.xlu1 %31 }
  0x81   :  { %vm33_vm1 = vcmp.eq.s32.totalorder %v29_v5, %v32_v6 }
  0x8e   :  { %v17_v7 = vpop.xlane.xlu0 %16 }
  0x8f   :  { %v18_v8 = vsub.f32 %v12_v0, %v17_v7 }
  0x91   :  { %v19_v9 = vmul.f32 1.442695, %v18_v8  ;;  %v34_v10 = vsel %vm33_vm1, %v18_v8, 0.0 }
  0x92   :  { %v35_v11 = vsel %vm14_vm0, %v34_v10, 0.0 }
  0x93   :  { %87 = vpow2.f32 %v19_v9  ;;  %36 = vadd.xlane.f32.xlu1 %v35_v11 }
  0xa0   :  { %v88_v12 = vpop.eup %87 }
  0xa1   :  { %v21_v13 = vsel %vm14_vm0, %v88_v12, 0.0 }
  0xa2   :  { %22 = vadd.xlane.f32.xlu0 %v21_v13 }
 0x11c   :  { %v37_v20 = vpop.xlane.xlu1 %36 }
 0x11d   :  { %v45_v21 = vmul.f32 1.442695, %v37_v20 }
 0x12b   :  { %v23_v14 = vpop.xlane.xlu0 %22 }
 0x12c   :  { %89 = vrcp.f32 %v23_v14 }
 0x12d   :  { %91 = vpow2.f32 %v45_v21 }
 0x12e   :  { %93 = vlog2.f32 %v23_v14 }
 0x139   :  { %v90_v15 = vpop.eup %89 }
 0x13a   :  { %v39_v16 = vmul.f32 %v90_v15, %v88_v12  ;;  %v92_v22 = vpop.eup %91 }
 0x13b   :  { %v47_v23 = vmul.f32 %v92_v22, %v90_v15  ;;  %v94_v24 = vpop.eup %93 }
 0x13c   :  { %v40_v17 = vmax.f32 %v39_v16, 1e-07  ;;  %v25_v25 = vmul.f32 0.6931472, %v94_v24 }
 0x13d   :  { %v48_v26 = vmax.f32 %v47_v23, 1e-07 }
 0x13e   :  { %v41_v18 = vmin.f32 %v40_v17, 1.0  ;;  %v38_v28 = vsub.f32 %v25_v25, %v37_v20 }
 0x13f   :  { %v49_v27 = vmin.f32 %v48_v26, 1.0 }
 0x140   :  { %v42_v19 = vsel %vm14_vm0, %v41_v18, 0.0  ;;  %v58_v32 = vmul.f32 0.1, %v38_v28 }
 0x141   :  { %43 = vadd.xlane.f32.xlu0 %v42_v19 }
 0x1ca   :  { %v44_v29 = vpop.xlane.xlu0 %43 }
 0x1cb   :  { %v50_v30 = vsub.f32 %v44_v29, %v49_v27 }
 0x1cd   :  { %v51_v31 = vmul.f32 9.2103405, %v50_v30 }
 0x1cf   :  { %v59_v33 = vadd.f32 %v58_v32, %v51_v31 }
 0x1d1   :  { %v61_v34 = vrot.slane %v59_v33, 4 }
 0x1d3   :  { %v62_v35 = vadd.f32 %v61_v34, %v59_v33 }
 0x1d5   :  { %v63_v36 = vrot.slane %v62_v35, 2 }
 0x1d7   :  { %v64_v37 = vadd.f32 %v63_v36, %v62_v35 }
 0x1d9   :  { %v65_v38 = vrot.slane %v64_v37, 1 }
 0x1db   :  { %v66_v39 = vadd.f32 %v65_v38, %v64_v37 }
 0x1dd   :  { %68 = vst.msk [vmem:[#allocation2] sm:$0x1] %vm67_vm2, %v66_v39 }
 0x1de   :  { %106 = shalt.err (!%p103_p4)
}
 0x1df   :  { %78 = dma.vmem_to_hbm [thread:$0]  %s76_s1, 16, %s149_s2, [#allocation3]  }
 0x1e0   :  { %115 = dma.done.wait [#allocation3], 16  }
 0x1e1   :  { %116 = vsyncadd [#allocation3], 4294967280 }
 0x1e2   :  { %82 = vsyncpa [#allocation3], 1 }

</bundles_post_ra>
